<compile_context>
chip_gen: v6e
topology: v6e:2x2x1
jax: 0.10.0
libtpu: 0.0.40
codegen_flags: <defaults>
</compile_context>

<pallas_src>
import functools

import jax
import jax.numpy as jnp
from jax.experimental import pallas as pl
from jax.experimental.pallas import tpu as pltpu

_LANE = 128
_SUBLANE = 8


def _relu(x):
    return jnp.maximum(x, 0.0)


def _mm(x, w_ref):
    # bf16 operands, f32 accumulation on the MXU.
    return jnp.dot(x.astype(jnp.bfloat16), w_ref[...],
                   preferred_element_type=jnp.float32)


def direct_predictor_kernel(
    msg_ref,
    w1_ref, b1_ref, w2_ref, b2_ref, w3_ref, b3_ref,
    wawt_ref, bat1_ref,
    wat2_ref, bat2_ref,
    wp1at_ref, bp1_ref,
    wp2_ref, bp2_ref,
    wp3_ref, bp3_ref,
    out_ref,
):
    # enc_hidden: Linear -> ReLU (x3)
    x = msg_ref[...]
    h = _relu(_mm(x, w1_ref) + b1_ref[...])
    h = _relu(_mm(h, w2_ref) + b2_ref[...])
    h = _relu(_mm(h, w3_ref) + b3_ref[...])

    # One MXU pass for the three matmuls that share `h`:
    #   cols [0 : 2*2*size)   -> layer-1 of obs_agents / obs_targets heads
    #   cols [2*2*size : end) -> hidden-part of pos layer-1 (no bias/relu here)
    n_at = bat1_ref.shape[-1]
    fused = _mm(h, wawt_ref)
    at_h = _relu(fused[:, :n_at] + bat1_ref[...])
    pos_h_part = fused[:, n_at:]

    # Obs heads layer-2: block-diagonal weight, outputs embedded at lane offsets
    # [2 : 2+2*obs_size) of the padded output slab ([pos | oa | ot | 0...]).
    oat_slab = _mm(at_h, wat2_ref) + bat2_ref[...]

    # pos head.  wp1at has its nonzero rows at [2 : 2+2*obs_size) so the padded
    # slab is used directly as the LHS (zero rows contribute exact zeros).
    p = _relu(pos_h_part + _mm(oat_slab, wp1at_ref) + bp1_ref[...])
    p = _relu(_mm(p, wp2_ref) + bp2_ref[...])
    pos_slab = _mm(p, wp3_ref) + bp3_ref[...]  # pos embedded at lanes [0:2)

    # Single lane-dense full-block store.
    out_ref[...] = pos_slab + oat_slab


def init_params(key, message_size, obs_size, size):
    """PyTorch-style uniform(+/- 1/sqrt(fan_in)) init.  Weights stored [in, out]."""
    dims = {
        # enc_hidden
        "w1": (message_size, size * 2), "w2": (size * 2, size * 2), "w3": (size * 2, size),
        # obs_targets_mean_std
        "wt1": (size, size * 2), "wt2": (size * 2, obs_size),
        # obs_agents_mean_std
        "wa1": (size, size * 2), "wa2": (size * 2, obs_size),
        # pos_mean_std (layer-1 split over the concat rows: hidden / agents / targets)
        "wp1h": (size, size * 2), "wp1a": (obs_size, size * 2), "wp1t": (obs_size, size * 2),
        "wp2": (size * 2, size), "wp3": (size, 2),
    }
    params = {}
    keys = jax.random.split(key, 2 * len(dims))
    for i, (name, (fan_in, fan_out)) in enumerate(dims.items()):
        bound = 1.0 / jnp.sqrt(jnp.float32(fan_in))
        params[name] = jax.random.uniform(
            keys[2 * i], (fan_in, fan_out), jnp.float32, -bound, bound)
        params["b" + name[1:]] = jax.random.uniform(
            keys[2 * i + 1], (1, fan_out), jnp.float32, -bound, bound)
    # the three split pieces of pos layer-1 share one bias
    params["bp1"] = params.pop("bp1h")
    del params["bp1a"], params["bp1t"]
    return params


def pack_params(params, obs_size):
    """Pre-pack f32 [in,out] params into the fused bf16 layout (call once)."""
    f32, bf16 = jnp.float32, jnp.bfloat16
    size2 = params["wa1"].shape[-1]      # 2 * size
    size = params["wp3"].shape[0]        # size
    out_width = 2 + 2 * obs_size
    out_pad = ((out_width + _LANE - 1) // _LANE) * _LANE

    # layer-1 of both obs heads + hidden-part of pos layer-1 share LHS `h`
    w_awt = jnp.concatenate([params["wa1"], params["wt1"], params["wp1h"]], axis=1)
    b_at1 = jnp.concatenate([params["ba1"], params["bt1"]], axis=1)

    # layer-2 of the obs heads: block-diagonal, embedded at lanes [2 : 2+2*obs)
    wat2 = jnp.zeros((2 * size2, out_pad), f32)
    wat2 = wat2.at[:size2, 2:2 + obs_size].set(params["wa2"])
    wat2 = wat2.at[size2:, 2 + obs_size:2 + 2 * obs_size].set(params["wt2"])
    bat2 = jnp.zeros((1, out_pad), f32)
    bat2 = bat2.at[:, 2:2 + obs_size].set(params["ba2"])
    bat2 = bat2.at[:, 2 + obs_size:2 + 2 * obs_size].set(params["bt2"])

    # pos layer-1, [agents ; targets] rows embedded to match the slab lanes
    wp1at = jnp.zeros((out_pad, size2), f32)
    wp1at = wp1at.at[2:2 + obs_size, :].set(params["wp1a"])
    wp1at = wp1at.at[2 + obs_size:2 + 2 * obs_size, :].set(params["wp1t"])

    # pos layer-3 embedded at lanes [0:2)
    wp3 = jnp.zeros((size, out_pad), f32).at[:, :2].set(params["wp3"])
    bp3 = jnp.zeros((1, out_pad), f32).at[:, :2].set(params["bp3"])

    return dict(
        w1=params["w1"].astype(bf16), b1=params["b1"],
        w2=params["w2"].astype(bf16), b2=params["b2"],
        w3=params["w3"].astype(bf16), b3=params["b3"],
        w_awt=w_awt.astype(bf16), b_at1=b_at1,
        w_at2=wat2.astype(bf16), b_at2=bat2,
        w_p1at=wp1at.astype(bf16), bp1=params["bp1"],
        wp2=params["wp2"].astype(bf16), bp2=params["bp2"],
        wp3=wp3.astype(bf16), bp3=bp3,
    )


def _batch_tile(batch):
    # Keep per-step VMEM tiny (works within v7x's 64 MiB budget) while giving
    # >= 2 grid blocks (megacore / 2-TC sharding) once the batch is large.
    if batch >= 1024:
        return 512
    if batch >= 256:
        return 128
    return max(_SUBLANE, ((batch + _SUBLANE - 1) // _SUBLANE) * _SUBLANE)


@functools.partial(jax.jit, static_argnames=("obs_size", "dosqrt"))
def direct_predictor_forward(message, packed, *, obs_size, dosqrt=False):
    batch, message_size = message.shape
    out_pad = packed["bp3"].shape[-1]
    size = packed["wp2"].shape[-1]
    size2 = 2 * size

    tb = _batch_tile(batch)
    padded = ((batch + tb - 1) // tb) * tb
    x = message.astype(jnp.bfloat16)          # halves input DMA bytes
    if padded != batch:
        x = jnp.pad(x, ((0, padded - batch), (0, 0)))
    grid = (padded // tb,)

    weights = [
        packed["w1"], packed["b1"], packed["w2"], packed["b2"],
        packed["w3"], packed["b3"],
        packed["w_awt"], packed["b_at1"],
        packed["w_at2"], packed["b_at2"],
        packed["w_p1at"], packed["bp1"],
        packed["wp2"], packed["bp2"],
        packed["wp3"], packed["bp3"],
    ]
    # Constant index_map -> weights/biases stay resident in VMEM across steps.
    w_specs = [pl.BlockSpec(w.shape, lambda i: (0, 0)) for w in weights]

    flops = 2 * batch * (
        message_size * size2 + size2 * size2 + size2 * size      # enc_hidden
        + size * 3 * size2                                       # fused head layer-1
        + 2 * size2 * 2 * obs_size                               # head layer-2
        + 2 * obs_size * size2 + size2 * size + size * 2         # pos head
    )
    bytes_accessed = int(
        x.size * x.dtype.itemsize
        + padded * out_pad * 4
        + sum(w.size * w.dtype.itemsize for w in weights)
    )

    out = pl.pallas_call(
        direct_predictor_kernel,
        out_shape=jax.ShapeDtypeStruct((padded, out_pad), jnp.float32),
        grid=grid,
        in_specs=[pl.BlockSpec((tb, message_size), lambda i: (i, 0))] + w_specs,
        out_specs=pl.BlockSpec((tb, out_pad), lambda i: (i, 0)),
        compiler_params=pltpu.CompilerParams(
            dimension_semantics=("parallel",),
            vmem_limit_bytes=32 * 1024 * 1024,
        ),
        cost_estimate=pl.CostEstimate(
            flops=flops, transcendentals=0, bytes_accessed=bytes_accessed),
    )(x, *weights)

    pos = out[:batch, 0:2]
    obs_agents = out[:batch, 2:2 + obs_size]
    obs_targets = out[:batch, 2 + obs_size:2 + 2 * obs_size]
    if dosqrt:  # dosqrt=True branch of the PyTorch module (elementwise sqrt)
        pos, obs_agents, obs_targets = map(jnp.sqrt, (pos, obs_agents, obs_targets))
    return {"pos": pos, "obs_agents": obs_agents, "obs_targets": obs_targets}


def reference_forward(message, params, dosqrt=False):
    """Pure-JAX reference mirroring the PyTorch module with the same precision
    policy as the kernel (bf16 operands, f32 accumulation)."""
    bf = jnp.bfloat16
    mm = lambda a, b: jnp.dot(a.astype(bf), b.astype(bf),
                              preferred_element_type=jnp.float32)
    r = lambda x: jnp.maximum(x, 0.0)
    h = r(mm(message, params["w1"]) + params["b1"])
    h = r(mm(h, params["w2"]) + params["b2"])
    h = r(mm(h, params["w3"]) + params["b3"])
    oa = mm(r(mm(h, params["wa1"]) + params["ba1"]), params["wa2"]) + params["ba2"]
    ot = mm(r(mm(h, params["wt1"]) + params["bt1"]), params["wt2"]) + params["bt2"]
    cat = jnp.concatenate([h, oa, ot], axis=-1)
    wp1 = jnp.concatenate([params["wp1h"], params["wp1a"], params["wp1t"]], axis=0)
    p = r(mm(cat, wp1) + params["bp1"])
    p = r(mm(p, params["wp2"]) + params["bp2"])
    p = mm(p, params["wp3"]) + params["bp3"]
    res = {"pos": p, "obs_agents": oa, "obs_targets": ot}
    if dosqrt:
        res = {k: jnp.sqrt(v) for k, v in res.items()}
    return res


if __name__ == "__main__":
    # small shapes: batch=8, message_size=16, obs_size=4, DIRECT_MODEL_SCALE(size)=32
    batch, message_size, obs_size, size = 8, 16, 4, 32

    key = jax.random.PRNGKey(0)
    k_msg, k_params = jax.random.split(key)
    message = jax.random.normal(k_msg, (batch, message_size), jnp.float32)
    params = init_params(k_params, message_size, obs_size, size)
    packed = pack_params(params, obs_size)       # one-time weight packing

    out = direct_predictor_forward(message, packed, obs_size=obs_size)
    jax.block_until_ready(out)

    ref = reference_forward(message, params)
    for k in ("pos", "obs_agents", "obs_targets"):
        assert out[k].shape == ref[k].shape, (k, out[k].shape, ref[k].shape)
        assert jnp.allclose(out[k], ref[k], atol=2e-3, rtol=2e-3), (
            k, float(jnp.max(jnp.abs(out[k] - ref[k]))))

    print("KERNEL_OK")
</pallas_src>

<mosaic_0001>
module attributes {stable_mosaic.version = 11 : i64} {
  func.func @direct_predictor_kernel(%arg0: i32, %arg1: memref<8x16xbf16, #tpu.memory_space<vmem>>, %arg2: memref<16x64xbf16, #tpu.memory_space<vmem>>, %arg3: memref<1x64xf32, #tpu.memory_space<vmem>>, %arg4: memref<64x64xbf16, #tpu.memory_space<vmem>>, %arg5: memref<1x64xf32, #tpu.memory_space<vmem>>, %arg6: memref<64x32xbf16, #tpu.memory_space<vmem>>, %arg7: memref<1x32xf32, #tpu.memory_space<vmem>>, %arg8: memref<32x192xbf16, #tpu.memory_space<vmem>>, %arg9: memref<1x128xf32, #tpu.memory_space<vmem>>, %arg10: memref<128x128xbf16, #tpu.memory_space<vmem>>, %arg11: memref<1x128xf32, #tpu.memory_space<vmem>>, %arg12: memref<128x64xbf16, #tpu.memory_space<vmem>>, %arg13: memref<1x64xf32, #tpu.memory_space<vmem>>, %arg14: memref<64x32xbf16, #tpu.memory_space<vmem>>, %arg15: memref<1x32xf32, #tpu.memory_space<vmem>>, %arg16: memref<32x128xbf16, #tpu.memory_space<vmem>>, %arg17: memref<1x128xf32, #tpu.memory_space<vmem>>, %arg18: memref<8x128xf32, #tpu.memory_space<vmem>>) attributes {dimension_semantics = [#tpu.dimension_semantics<parallel>], iteration_bounds = array<i64: 1>, scalar_prefetch = 0 : i64, scratch_operands = 0 : i64, tpu.core_type = #tpu.core_type<tc>, window_params = [{transform_indices = @transform_0, window_bounds = array<i64: 8, 16>}, {pipeline_mode = #tpu.pipeline_mode<synchronous>, transform_indices = @transform_1, window_bounds = array<i64: 16, 64>}, {pipeline_mode = #tpu.pipeline_mode<synchronous>, transform_indices = @transform_2, window_bounds = array<i64: 1, 64>}, {pipeline_mode = #tpu.pipeline_mode<synchronous>, transform_indices = @transform_3, window_bounds = array<i64: 64, 64>}, {pipeline_mode = #tpu.pipeline_mode<synchronous>, transform_indices = @transform_4, window_bounds = array<i64: 1, 64>}, {pipeline_mode = #tpu.pipeline_mode<synchronous>, transform_indices = @transform_5, window_bounds = array<i64: 64, 32>}, {pipeline_mode = #tpu.pipeline_mode<synchronous>, transform_indices = @transform_6, window_bounds = array<i64: 1, 32>}, {pipeline_mode = #tpu.pipeline_mode<synchronous>, transform_indices = @transform_7, window_bounds = array<i64: 32, 192>}, {pipeline_mode = #tpu.pipeline_mode<synchronous>, transform_indices = @transform_8, window_bounds = array<i64: 1, 128>}, {pipeline_mode = #tpu.pipeline_mode<synchronous>, transform_indices = @transform_9, window_bounds = array<i64: 128, 128>}, {pipeline_mode = #tpu.pipeline_mode<synchronous>, transform_indices = @transform_10, window_bounds = array<i64: 1, 128>}, {pipeline_mode = #tpu.pipeline_mode<synchronous>, transform_indices = @transform_11, window_bounds = array<i64: 128, 64>}, {pipeline_mode = #tpu.pipeline_mode<synchronous>, transform_indices = @transform_12, window_bounds = array<i64: 1, 64>}, {pipeline_mode = #tpu.pipeline_mode<synchronous>, transform_indices = @transform_13, window_bounds = array<i64: 64, 32>}, {pipeline_mode = #tpu.pipeline_mode<synchronous>, transform_indices = @transform_14, window_bounds = array<i64: 1, 32>}, {pipeline_mode = #tpu.pipeline_mode<synchronous>, transform_indices = @transform_15, window_bounds = array<i64: 32, 128>}, {pipeline_mode = #tpu.pipeline_mode<synchronous>, transform_indices = @transform_16, window_bounds = array<i64: 1, 128>}, {transform_indices = @transform_17, window_bounds = array<i64: 8, 128>}]} {
    %c0 = arith.constant 0 : index
    %c0_0 = arith.constant 0 : index
    %0 = vector.load %arg1[%c0, %c0_0] : memref<8x16xbf16, #tpu.memory_space<vmem>>, vector<8x16xbf16>
    %c0_1 = arith.constant 0 : index
    %c0_2 = arith.constant 0 : index
    %1 = vector.load %arg2[%c0_1, %c0_2] : memref<16x64xbf16, #tpu.memory_space<vmem>>, vector<16x64xbf16>
    %cst = arith.constant dense<0.000000e+00> : vector<8x64xf32>
    %2 = tpu.matmul %0, %1, %cst {dimension_numbers = #tpu.dot_dimension_numbers<[1], [0], [0], [1], [0, 0, 1, 1], [], []>} : vector<8x16xbf16>, vector<16x64xbf16>, vector<8x64xf32> -> vector<8x64xf32>
    %c0_3 = arith.constant 0 : index
    %c0_4 = arith.constant 0 : index
    %3 = vector.load %arg3[%c0_3, %c0_4] : memref<1x64xf32, #tpu.memory_space<vmem>>, vector<1x64xf32>
    %4 = vector.broadcast %3 : vector<1x64xf32> to vector<8x64xf32>
    %5 = arith.addf %2, %4 : vector<8x64xf32>
    %cst_5 = arith.constant 0.000000e+00 : f32
    %6 = vector.broadcast %cst_5 : f32 to vector<8x64xf32>
    %7 = arith.maximumf %5, %6 : vector<8x64xf32>
    %8 = arith.truncf %7 : vector<8x64xf32> to vector<8x64xbf16>
    %c0_6 = arith.constant 0 : index
    %c0_7 = arith.constant 0 : index
    %9 = vector.load %arg4[%c0_6, %c0_7] : memref<64x64xbf16, #tpu.memory_space<vmem>>, vector<64x64xbf16>
    %cst_8 = arith.constant dense<0.000000e+00> : vector<8x64xf32>
    %10 = tpu.matmul %8, %9, %cst_8 {dimension_numbers = #tpu.dot_dimension_numbers<[1], [0], [0], [1], [0, 0, 1, 1], [], []>} : vector<8x64xbf16>, vector<64x64xbf16>, vector<8x64xf32> -> vector<8x64xf32>
    %c0_9 = arith.constant 0 : index
    %c0_10 = arith.constant 0 : index
    %11 = vector.load %arg5[%c0_9, %c0_10] : memref<1x64xf32, #tpu.memory_space<vmem>>, vector<1x64xf32>
    %12 = vector.broadcast %11 : vector<1x64xf32> to vector<8x64xf32>
    %13 = arith.addf %10, %12 : vector<8x64xf32>
    %cst_11 = arith.constant 0.000000e+00 : f32
    %14 = vector.broadcast %cst_11 : f32 to vector<8x64xf32>
    %15 = arith.maximumf %13, %14 : vector<8x64xf32>
    %16 = arith.truncf %15 : vector<8x64xf32> to vector<8x64xbf16>
    %c0_12 = arith.constant 0 : index
    %c0_13 = arith.constant 0 : index
    %17 = vector.load %arg6[%c0_12, %c0_13] : memref<64x32xbf16, #tpu.memory_space<vmem>>, vector<64x32xbf16>
    %cst_14 = arith.constant dense<0.000000e+00> : vector<8x32xf32>
    %18 = tpu.matmul %16, %17, %cst_14 {dimension_numbers = #tpu.dot_dimension_numbers<[1], [0], [0], [1], [0, 0, 1, 1], [], []>} : vector<8x64xbf16>, vector<64x32xbf16>, vector<8x32xf32> -> vector<8x32xf32>
    %c0_15 = arith.constant 0 : index
    %c0_16 = arith.constant 0 : index
    %19 = vector.load %arg7[%c0_15, %c0_16] : memref<1x32xf32, #tpu.memory_space<vmem>>, vector<1x32xf32>
    %20 = vector.broadcast %19 : vector<1x32xf32> to vector<8x32xf32>
    %21 = arith.addf %18, %20 : vector<8x32xf32>
    %cst_17 = arith.constant 0.000000e+00 : f32
    %22 = vector.broadcast %cst_17 : f32 to vector<8x32xf32>
    %23 = arith.maximumf %21, %22 : vector<8x32xf32>
    %24 = arith.truncf %23 : vector<8x32xf32> to vector<8x32xbf16>
    %c0_18 = arith.constant 0 : index
    %c0_19 = arith.constant 0 : index
    %25 = vector.load %arg8[%c0_18, %c0_19] : memref<32x192xbf16, #tpu.memory_space<vmem>>, vector<32x192xbf16>
    %cst_20 = arith.constant dense<0.000000e+00> : vector<8x192xf32>
    %26 = tpu.matmul %24, %25, %cst_20 {dimension_numbers = #tpu.dot_dimension_numbers<[1], [0], [0], [1], [0, 0, 1, 1], [], []>} : vector<8x32xbf16>, vector<32x192xbf16>, vector<8x192xf32> -> vector<8x192xf32>
    %27 = vector.extract_strided_slice %26 {offsets = [0, 0], sizes = [8, 128], strides = [1, 1]} : vector<8x192xf32> to vector<8x128xf32>
    %c0_21 = arith.constant 0 : index
    %c0_22 = arith.constant 0 : index
    %28 = vector.load %arg9[%c0_21, %c0_22] : memref<1x128xf32, #tpu.memory_space<vmem>>, vector<1x128xf32>
    %29 = vector.broadcast %28 : vector<1x128xf32> to vector<8x128xf32>
    %30 = arith.addf %27, %29 : vector<8x128xf32>
    %cst_23 = arith.constant 0.000000e+00 : f32
    %31 = vector.broadcast %cst_23 : f32 to vector<8x128xf32>
    %32 = arith.maximumf %30, %31 : vector<8x128xf32>
    %33 = vector.extract_strided_slice %26 {offsets = [0, 128], sizes = [8, 64], strides = [1, 1]} : vector<8x192xf32> to vector<8x64xf32>
    %34 = arith.truncf %32 : vector<8x128xf32> to vector<8x128xbf16>
    %c0_24 = arith.constant 0 : index
    %c0_25 = arith.constant 0 : index
    %35 = vector.load %arg10[%c0_24, %c0_25] : memref<128x128xbf16, #tpu.memory_space<vmem>>, vector<128x128xbf16>
    %cst_26 = arith.constant dense<0.000000e+00> : vector<8x128xf32>
    %36 = tpu.matmul %34, %35, %cst_26 {dimension_numbers = #tpu.dot_dimension_numbers<[1], [0], [0], [1], [0, 0, 1, 1], [], []>} : vector<8x128xbf16>, vector<128x128xbf16>, vector<8x128xf32> -> vector<8x128xf32>
    %c0_27 = arith.constant 0 : index
    %c0_28 = arith.constant 0 : index
    %37 = vector.load %arg11[%c0_27, %c0_28] : memref<1x128xf32, #tpu.memory_space<vmem>>, vector<1x128xf32>
    %38 = vector.broadcast %37 : vector<1x128xf32> to vector<8x128xf32>
    %39 = arith.addf %36, %38 : vector<8x128xf32>
    %40 = arith.truncf %39 : vector<8x128xf32> to vector<8x128xbf16>
    %c0_29 = arith.constant 0 : index
    %c0_30 = arith.constant 0 : index
    %41 = vector.load %arg12[%c0_29, %c0_30] : memref<128x64xbf16, #tpu.memory_space<vmem>>, vector<128x64xbf16>
    %cst_31 = arith.constant dense<0.000000e+00> : vector<8x64xf32>
    %42 = tpu.matmul %40, %41, %cst_31 {dimension_numbers = #tpu.dot_dimension_numbers<[1], [0], [0], [1], [0, 0, 1, 1], [], []>} : vector<8x128xbf16>, vector<128x64xbf16>, vector<8x64xf32> -> vector<8x64xf32>
    %43 = arith.addf %33, %42 : vector<8x64xf32>
    %c0_32 = arith.constant 0 : index
    %c0_33 = arith.constant 0 : index
    %44 = vector.load %arg13[%c0_32, %c0_33] : memref<1x64xf32, #tpu.memory_space<vmem>>, vector<1x64xf32>
    %45 = vector.broadcast %44 : vector<1x64xf32> to vector<8x64xf32>
    %46 = arith.addf %43, %45 : vector<8x64xf32>
    %cst_34 = arith.constant 0.000000e+00 : f32
    %47 = vector.broadcast %cst_34 : f32 to vector<8x64xf32>
    %48 = arith.maximumf %46, %47 : vector<8x64xf32>
    %49 = arith.truncf %48 : vector<8x64xf32> to vector<8x64xbf16>
    %c0_35 = arith.constant 0 : index
    %c0_36 = arith.constant 0 : index
    %50 = vector.load %arg14[%c0_35, %c0_36] : memref<64x32xbf16, #tpu.memory_space<vmem>>, vector<64x32xbf16>
    %cst_37 = arith.constant dense<0.000000e+00> : vector<8x32xf32>
    %51 = tpu.matmul %49, %50, %cst_37 {dimension_numbers = #tpu.dot_dimension_numbers<[1], [0], [0], [1], [0, 0, 1, 1], [], []>} : vector<8x64xbf16>, vector<64x32xbf16>, vector<8x32xf32> -> vector<8x32xf32>
    %c0_38 = arith.constant 0 : index
    %c0_39 = arith.constant 0 : index
    %52 = vector.load %arg15[%c0_38, %c0_39] : memref<1x32xf32, #tpu.memory_space<vmem>>, vector<1x32xf32>
    %53 = vector.broadcast %52 : vector<1x32xf32> to vector<8x32xf32>
    %54 = arith.addf %51, %53 : vector<8x32xf32>
    %cst_40 = arith.constant 0.000000e+00 : f32
    %55 = vector.broadcast %cst_40 : f32 to vector<8x32xf32>
    %56 = arith.maximumf %54, %55 : vector<8x32xf32>
    %57 = arith.truncf %56 : vector<8x32xf32> to vector<8x32xbf16>
    %c0_41 = arith.constant 0 : index
    %c0_42 = arith.constant 0 : index
    %58 = vector.load %arg16[%c0_41, %c0_42] : memref<32x128xbf16, #tpu.memory_space<vmem>>, vector<32x128xbf16>
    %cst_43 = arith.constant dense<0.000000e+00> : vector<8x128xf32>
    %59 = tpu.matmul %57, %58, %cst_43 {dimension_numbers = #tpu.dot_dimension_numbers<[1], [0], [0], [1], [0, 0, 1, 1], [], []>} : vector<8x32xbf16>, vector<32x128xbf16>, vector<8x128xf32> -> vector<8x128xf32>
    %c0_44 = arith.constant 0 : index
    %c0_45 = arith.constant 0 : index
    %60 = vector.load %arg17[%c0_44, %c0_45] : memref<1x128xf32, #tpu.memory_space<vmem>>, vector<1x128xf32>
    %61 = vector.broadcast %60 : vector<1x128xf32> to vector<8x128xf32>
    %62 = arith.addf %59, %61 : vector<8x128xf32>
    %63 = arith.addf %62, %39 : vector<8x128xf32>
    %c0_46 = arith.constant 0 : index
    %c0_47 = arith.constant 0 : index
    %64 = vector.load %arg18[%c0_46, %c0_47] : memref<8x128xf32, #tpu.memory_space<vmem>>, vector<8x128xf32>
    tpu.vector_store %arg18[%c0_46, %c0_47], %63 {strides = array<i32>} : memref<8x128xf32, #tpu.memory_space<vmem>>, vector<8x128xf32>,
    return
  }
  func.func @transform_0(%arg0: i32) -> (i32, i32) {
    %c0_i32 = arith.constant 0 : i32
    %c0_i32_0 = arith.constant 0 : i32
    return %arg0, %c0_i32 : i32, i32
  }
  func.func @transform_1(%arg0: i32) -> (i32, i32) {
    %c0_i32 = arith.constant 0 : i32
    %c0_i32_0 = arith.constant 0 : i32
    %c0_i32_1 = arith.constant 0 : i32
    return %c0_i32, %c0_i32_0 : i32, i32
  }
  func.func @transform_2(%arg0: i32) -> (i32, i32) {
    %c0_i32 = arith.constant 0 : i32
    %c0_i32_0 = arith.constant 0 : i32
    %c0_i32_1 = arith.constant 0 : i32
    return %c0_i32, %c0_i32_0 : i32, i32
  }
  func.func @transform_3(%arg0: i32) -> (i32, i32) {
    %c0_i32 = arith.constant 0 : i32
    %c0_i32_0 = arith.constant 0 : i32
    %c0_i32_1 = arith.constant 0 : i32
    return %c0_i32, %c0_i32_0 : i32, i32
  }
  func.func @transform_4(%arg0: i32) -> (i32, i32) {
    %c0_i32 = arith.constant 0 : i32
    %c0_i32_0 = arith.constant 0 : i32
    %c0_i32_1 = arith.constant 0 : i32
    return %c0_i32, %c0_i32_0 : i32, i32
  }
  func.func @transform_5(%arg0: i32) -> (i32, i32) {
    %c0_i32 = arith.constant 0 : i32
    %c0_i32_0 = arith.constant 0 : i32
    %c0_i32_1 = arith.constant 0 : i32
    return %c0_i32, %c0_i32_0 : i32, i32
  }
  func.func @transform_6(%arg0: i32) -> (i32, i32) {
    %c0_i32 = arith.constant 0 : i32
    %c0_i32_0 = arith.constant 0 : i32
    %c0_i32_1 = arith.constant 0 : i32
    return %c0_i32, %c0_i32_0 : i32, i32
  }
  func.func @transform_7(%arg0: i32) -> (i32, i32) {
    %c0_i32 = arith.constant 0 : i32
    %c0_i32_0 = arith.constant 0 : i32
    %c0_i32_1 = arith.constant 0 : i32
    return %c0_i32, %c0_i32_0 : i32, i32
  }
  func.func @transform_8(%arg0: i32) -> (i32, i32) {
    %c0_i32 = arith.constant 0 : i32
    %c0_i32_0 = arith.constant 0 : i32
    %c0_i32_1 = arith.constant 0 : i32
    return %c0_i32, %c0_i32_0 : i32, i32
  }
  func.func @transform_9(%arg0: i32) -> (i32, i32) {
    %c0_i32 = arith.constant 0 : i32
    %c0_i32_0 = arith.constant 0 : i32
    %c0_i32_1 = arith.constant 0 : i32
    return %c0_i32, %c0_i32_0 : i32, i32
  }
  func.func @transform_10(%arg0: i32) -> (i32, i32) {
    %c0_i32 = arith.constant 0 : i32
    %c0_i32_0 = arith.constant 0 : i32
    %c0_i32_1 = arith.constant 0 : i32
    return %c0_i32, %c0_i32_0 : i32, i32
  }
  func.func @transform_11(%arg0: i32) -> (i32, i32) {
    %c0_i32 = arith.constant 0 : i32
    %c0_i32_0 = arith.constant 0 : i32
    %c0_i32_1 = arith.constant 0 : i32
    return %c0_i32, %c0_i32_0 : i32, i32
  }
  func.func @transform_12(%arg0: i32) -> (i32, i32) {
    %c0_i32 = arith.constant 0 : i32
    %c0_i32_0 = arith.constant 0 : i32
    %c0_i32_1 = arith.constant 0 : i32
    return %c0_i32, %c0_i32_0 : i32, i32
  }
  func.func @transform_13(%arg0: i32) -> (i32, i32) {
    %c0_i32 = arith.constant 0 : i32
    %c0_i32_0 = arith.constant 0 : i32
    %c0_i32_1 = arith.constant 0 : i32
    return %c0_i32, %c0_i32_0 : i32, i32
  }
  func.func @transform_14(%arg0: i32) -> (i32, i32) {
    %c0_i32 = arith.constant 0 : i32
    %c0_i32_0 = arith.constant 0 : i32
    %c0_i32_1 = arith.constant 0 : i32
    return %c0_i32, %c0_i32_0 : i32, i32
  }
  func.func @transform_15(%arg0: i32) -> (i32, i32) {
    %c0_i32 = arith.constant 0 : i32
    %c0_i32_0 = arith.constant 0 : i32
    %c0_i32_1 = arith.constant 0 : i32
    return %c0_i32, %c0_i32_0 : i32, i32
  }
  func.func @transform_16(%arg0: i32) -> (i32, i32) {
    %c0_i32 = arith.constant 0 : i32
    %c0_i32_0 = arith.constant 0 : i32
    %c0_i32_1 = arith.constant 0 : i32
    return %c0_i32, %c0_i32_0 : i32, i32
  }
  func.func @transform_17(%arg0: i32) -> (i32, i32) {
    %c0_i32 = arith.constant 0 : i32
    %c0_i32_0 = arith.constant 0 : i32
    return %arg0, %c0_i32 : i32, i32
  }
}

</mosaic_0001>

<bundles_post_ra>
// kernel: direct_predictor_forward.1
= control target key start
LH: loop header
LB: loop body
LE: loop exit
PB: predicated region body
PF: predicated region fallthrough
CT: control target
= control target key end

     0   :  { %v967_v0 = vmov 0.0   ;;  %vm968_vm0 = vmmov 0   ;;  %vm73_vm1 = vcmask 130048   ;;  %vm158_vm2 = vcmask 523264   ;;  %s1245_s1 = inlined_call_operand.vmem [shape: bf16[16,64], index: 1, kind: input, shape index: {}]   ;;  %s1246_s0 = inlined_call_operand.vmem [shape: bf16[8,16], index: 0, kind: input, shape index: {}]   ;;  %s1247_s3 = inlined_call_operand.vmem [shape: bf16[64,64], index: 3, kind: input, shape index: {}]   ;;  %s1248_s5 = inlined_call_operand.vmem [shape: bf16[64,32], index: 5, kind: input, shape index: {}]   ;;  %s1249_s2 = inlined_call_operand.vmem [shape: f32[1,64], index: 2, kind: input, shape index: {}]   ;;  %s1250_s7 = inlined_call_operand.vmem [shape: bf16[32,192], index: 7, kind: input, shape index: {}]   ;;  %s1251_s4 = inlined_call_operand.vmem [shape: f32[1,64], index: 4, kind: input, shape index: {}]   ;;  %s1252_s9 = inlined_call_operand.vmem [shape: bf16[128,128], index: 9, kind: input, shape index: {}]   ;;  %s1253_s6 = inlined_call_operand.vmem [shape: f32[1,32], index: 6, kind: input, shape index: {}]   ;;  %s1254_s11 = inlined_call_operand.vmem [shape: bf16[128,64], index: 11, kind: input, shape index: {}]   ;;  %s1255_s8 = inlined_call_operand.vmem [shape: f32[1,128], index: 8, kind: input, shape index: {}]   ;;  %s1256_s13 = inlined_call_operand.vmem [shape: bf16[64,32], index: 13, kind: input, shape index: {}]   ;;  %s1257_s10 = inlined_call_operand.vmem [shape: f32[1,128], index: 10, kind: input, shape index: {}]   ;;  %s1258_s15 = inlined_call_operand.vmem [shape: bf16[32,128], index: 15, kind: input, shape index: {}]   ;;  %s1259_s12 = inlined_call_operand.vmem [shape: f32[1,64], index: 12, kind: input, shape index: {}]   ;;  %s1260_s14 = inlined_call_operand.vmem [shape: f32[1,32], index: 14, kind: input, shape index: {}]   ;;  %s1261_s16 = inlined_call_operand.vmem [shape: f32[1,128], index: 16, kind: input, shape index: {}]   ;;  %s1262_s17 = inlined_call_operand.vmem [shape: f32[8,128], index: 17, kind: output, shape index: {}]  }
   0x1   :  { %1263 = sst [smem:[#allocation2_spill]] %s1245_s1  ;;  %837 = vmatprep.subr.bf16.mxu0 %v967_v0  ;;  %839 = vmatprep.mubr.msk.bf16.mxu0 %vm968_vm0, %v967_v0  ;;  %v931_v3 = vld [vmem:[%s1247_s3 + $0x18] sm:$0xff]   ;;  %v932_v4 = vld [vmem:[%s1247_s3 + $0x10] sm:$0xff]   ;;  %v933_v5 = vld [vmem:[%s1247_s3 + $0x8] sm:$0xff]   ;;  %v969_v31 = vmov 0   ;;  %vm312_vm3 = vcmask 261120  }
   0x2   :  { %1264 = sst [smem:[#allocation3_spill]] %s1246_s0  ;;  %843 = vmatprep.subr.bf16.mxu1 %v967_v0  ;;  %851 = vmatprep.mubr.msk.bf16.mxu1 %vm968_vm0, %v967_v0  ;;  %v934_v6 = vld [vmem:[%s1247_s3] sm:$0xff]   ;;  %v935_v7 = vld [vmem:[%s1248_s5 + $0x18] sm:$0xff]   ;;  %v936_v8 = vld [vmem:[%s1248_s5 + $0x10] sm:$0xff]  }
   0x3   :  { %s1265_s26 = sld [smem:[#allocation2_spill]]  ;;  %844 = vmatpush3.bf16.msra.mxu1 %v931_v3  ;;  %v750_v9 = vld [vmem:[%s1249_s2] ss:$0 sm:$0xff]  ;;  %v937_v17 = vld [vmem:[%s1248_s5 + $0x8] sm:$0xff]   ;;  %v939_v19 = vld [vmem:[%s1250_s7 + $0x10] ss:$8 sps:$4 sm:$0xff]  }
   0x4   :  { %s1266_s29 = sld [smem:[#allocation3_spill]]  ;;  %845 = vmatprep.subr.bf16.mxu1 %v967_v0  ;;  %v938_v18 = vld [vmem:[%s1248_s5] sm:$0xff]   ;;  %v941_v20 = vld [vmem:[%s1250_s7 + $0x14] ss:$8 sps:$4 sm:$0xff]   ;;  %v947_v34 = vld [vmem:[%s1252_s9 + $0x28] sm:$0xff]  }
   0x5   :  { %v753_v21 = vld [vmem:[%s1251_s4] ss:$0 sm:$0xff]  ;;  %v944_v29 = vld [vmem:[%s1250_s7 + $0x4] ss:$8 sps:$4 sm:$0xff]   ;;  %v945_v32 = vld [vmem:[%s1252_s9 + $0x38] sm:$0xff]  }
   0x6   :  { %v942_v30 = vld [vmem:[%s1250_s7] ss:$8 sps:$4 sm:$0xff]   ;;  %v946_v33 = vld [vmem:[%s1252_s9 + $0x30] sm:$0xff]   ;;  %v949_v36 = vld [vmem:[%s1252_s9 + $0x18] sm:$0xff]  }
   0x7   :  { %846 = vmatpush3.bf16.msra.mxu1 %v932_v4  ;;  %v948_v35 = vld [vmem:[%s1252_s9 + $0x20] sm:$0xff]   ;;  %v950_v37 = vld [vmem:[%s1252_s9 + $0x10] sm:$0xff]   ;;  %v951_v46 = vld [vmem:[%s1252_s9 + $0x8] sm:$0xff]  }
   0x8   :  { %847 = vmatprep.subr.bf16.mxu1 %v967_v0  ;;  %v759_v38 = vld [vmem:[%s1253_s6] ss:$0 sm:$0xff]  ;;  %v953_v48 = vld [vmem:[%s1254_s11 + $0x38] sm:$0xff]   ;;  %v954_v49 = vld [vmem:[%s1254_s11 + $0x30] sm:$0xff]  }
   0x9   :  { %v930_v1 = vld [vmem:[%s1265_s26] sm:$0xff]   ;;  %v955_v50 = vld [vmem:[%s1254_s11 + $0x28] sm:$0xff]   ;;  %v957_v52 = vld [vmem:[%s1254_s11 + $0x18] sm:$0xff]  }
   0xa   :  { %v57_v2 = vld [vmem:[%s1266_s29] sm:$0xf]  ;;  %838 = vmatpush3.bf16.msra.mxu0 %v930_v1  ;;  %v958_v53 = vld [vmem:[%s1254_s11 + $0x10] sm:$0xff]   ;;  %v959_v54 = vld [vmem:[%s1254_s11 + $0x8] sm:$0xff]  }
   0xb   :  { %855 = vmatprep.subr.bf16.mxu0 %v967_v0  ;;  %848 = vmatpush3.bf16.msra.mxu1 %v933_v5  ;;  %v952_v47 = vld [vmem:[%s1252_s9] sm:$0xff]   ;;  %v961_v1 = vld [vmem:[%s1256_s13 + $0x18] sm:$0xff]  }
   0xc   :  { %849 = vmatprep.subr.bf16.mxu1 %v967_v0  ;;  %v956_v51 = vld [vmem:[%s1254_s11 + $0x20] sm:$0xff]  }
   0xd   :  { %840 = vmatmul.mubr.msk.bf16.vlgmr.msra.gmra.mxu0 %vm73_vm1, %v57_v2  ;;  %v770_v55 = vld [vmem:[%s1255_s8] ss:$0 sm:$0xff]  ;;  %v962_v2 = vld [vmem:[%s1256_s13 + $0x10] sm:$0xff]  }
   0xe   :  { %863 = vmatprep.mubr.msk.bf16.mxu0 %vm968_vm0, %v967_v0  ;;  %856 = vmatpush3.bf16.msra.mxu0 %v935_v7  ;;  %v960_v63 = vld [vmem:[%s1254_s11] sm:$0xff]  }
   0xf   :  { %850 = vmatpush3.bf16.msra.mxu1 %v934_v6  ;;  %857 = vmatprep.subr.bf16.mxu0 %v967_v0  ;;  %v771_v3 = vld [vmem:[%s1257_s10] ss:$0 sm:$0xff] }
  0x10   :  { %328 = vmatprep.subr.bf16.mxu1 %v941_v20 }
  0x12   :  { %858 = vmatpush3.bf16.msra.mxu0 %v936_v8 }
  0x13   :  { %859 = vmatprep.subr.bf16.mxu0 %v967_v0 }
  0x16   :  { %860 = vmatpush3.bf16.msra.mxu0 %v937_v17 }
  0x17   :  { %861 = vmatprep.subr.bf16.mxu0 %v967_v0 }
  0x1a   :  { %862 = vmatpush3.bf16.msra.mxu0 %v938_v18 }
  0x1b   :  { %867 = vmatprep.subr.bf16.mxu0 %v967_v0 }
  0xcd   :  { %v111_v10 = vpop.f32.mrf.mxu0 }
  0xce   :  { %v112_v11 = vadd.f32 %v750_v9, %v111_v10  ;;  %v963_v10 = vld [vmem:[%s1256_s13 + $0x8] sm:$0xff]  }
  0xcf   :  { %v841_v12 = vpop.f32.mrf.mxu0 }
  0xd0   :  { %v117_v13 = vmax.f32 %v112_v11, 0.0  ;;  %v964_v11 = vld [vmem:[%s1256_s13] sm:$0xff]   ;;  %v965_v12 = vld [vmem:[%s1258_s15 + $0x8] sm:$0xff]  }
  0xd1   :  { %v114_v14 = vpop.f32.mrf.mxu0 }
  0xd2   :  { %v118_v15 = vpack.c.bf16 %v117_v13, %v117_v13  ;;  %v788_v14 = vld [vmem:[%s1259_s12] ss:$0 sm:$0xff] }
  0xd3   :  { %v842_v16 = vpop.f32.mrf.mxu0 }
  0xd4   :  { %852 = vmatmul.mubr.msk.bf16.vlgmr.msra.gmra.mxu1 %vm158_vm2, %v118_v15 }
  0xd5   :  { %329 = vmatpush1.bf16.msra.mxu1 %v939_v19  ;;  %348 = vmatprep.mubr.bf16.mxu1 %v969_v31 }
  0xd6   :  { %330 = vmatprep.subr.bf16.mxu1 %v944_v29 }
  0xd9   :  { %331 = vmatpush1.bf16.msra.mxu1 %v942_v30  ;;  %v795_v30 = vld [vmem:[%s1261_s16] ss:$0 sm:$0xff] }
  0xda   :  { %887 = vmatprep.subr.bf16.mxu1 %v967_v0 }
 0x194   :  { %v196_v22 = vpop.f32.mrf.mxu1 }
 0x195   :  { %v197_v23 = vadd.f32 %v753_v21, %v196_v22  ;;  %v966_v22 = vld [vmem:[%s1258_s15] sm:$0xff]  }
 0x196   :  { %v853_v24 = vpop.f32.mrf.mxu1 }
 0x197   :  { %v202_v25 = vmax.f32 %v197_v23, 0.0 }
 0x198   :  { %v199_v26 = vpop.f32.mrf.mxu1 }
 0x199   :  { %v203_v27 = vpack.c.bf16 %v202_v25, %v202_v25 }
 0x19a   :  { %v854_v28 = vpop.f32.mrf.mxu1 }
 0x19b   :  { %864 = vmatmul.mubr.msk.bf16.vlgmr.msra.gmra.mxu0 %vm158_vm2, %v203_v27 }
 0x19c   :  { %883 = vmatprep.mubr.msk.bf16.mxu0 %vm968_vm0, %v967_v0  ;;  %868 = vmatpush3.bf16.msra.mxu0 %v945_v32 }
 0x19d   :  { %869 = vmatprep.subr.bf16.mxu0 %v967_v0 }
 0x1a0   :  { %870 = vmatpush3.bf16.msra.mxu0 %v946_v33 }
 0x1a1   :  { %871 = vmatprep.subr.bf16.mxu0 %v967_v0 }
 0x1a4   :  { %872 = vmatpush3.bf16.msra.mxu0 %v947_v34 }
 0x1a5   :  { %873 = vmatprep.subr.bf16.mxu0 %v967_v0 }
 0x1a8   :  { %874 = vmatpush3.bf16.msra.mxu0 %v948_v35 }
 0x1a9   :  { %875 = vmatprep.subr.bf16.mxu0 %v967_v0 }
 0x1ac   :  { %876 = vmatpush3.bf16.msra.mxu0 %v949_v36 }
 0x1ad   :  { %877 = vmatprep.subr.bf16.mxu0 %v967_v0 }
 0x1b0   :  { %878 = vmatpush3.bf16.msra.mxu0 %v950_v37 }
 0x1b1   :  { %879 = vmatprep.subr.bf16.mxu0 %v967_v0 }
 0x1b4   :  { %880 = vmatpush3.bf16.msra.mxu0 %v951_v46 }
 0x1b5   :  { %881 = vmatprep.subr.bf16.mxu0 %v967_v0 }
 0x1b8   :  { %882 = vmatpush3.bf16.msra.mxu0 %v952_v47 }
 0x1b9   :  { %907 = vmatprep.subr.bf16.mxu0 %v967_v0 }
 0x25b   :  { %v280_v39 = vpop.f32.mrf.mxu0 }
 0x25c   :  { %v281_v40 = vadd.f32 %v759_v38, %v280_v39 }
 0x25d   :  { %v865_v41 = vpop.f32.mrf.mxu0 }
 0x25e   :  { %v286_v42 = vmax.f32 %v281_v40, 0.0 }
 0x25f   :  { %v283_v43 = vpop.f32.mrf.mxu0 }
 0x260   :  { %v287_v44 = vpack.c.bf16 %v286_v42, %v286_v42 }
 0x261   :  { %v866_v45 = vpop.f32.mrf.mxu0 }
 0x262   :  { %769 = vmatmul.mubr.msk.bf16.vlgmr.msra.gmra.mxu1 %vm312_vm3, %v287_v44 }
 0x263   :  { %903 = vmatprep.mubr.msk.bf16.mxu1 %vm968_vm0, %v967_v0  ;;  %888 = vmatpush3.bf16.msra.mxu1 %v953_v48 }
 0x264   :  { %889 = vmatprep.subr.bf16.mxu1 %v967_v0 }
 0x267   :  { %890 = vmatpush3.bf16.msra.mxu1 %v954_v49 }
 0x268   :  { %891 = vmatprep.subr.bf16.mxu1 %v967_v0 }
 0x26b   :  { %892 = vmatpush3.bf16.msra.mxu1 %v955_v50 }
 0x26c   :  { %893 = vmatprep.subr.bf16.mxu1 %v967_v0 }
 0x26f   :  { %894 = vmatpush3.bf16.msra.mxu1 %v956_v51 }
 0x270   :  { %895 = vmatprep.subr.bf16.mxu1 %v967_v0 }
 0x273   :  { %896 = vmatpush3.bf16.msra.mxu1 %v957_v52 }
 0x274   :  { %897 = vmatprep.subr.bf16.mxu1 %v967_v0 }
 0x277   :  { %898 = vmatpush3.bf16.msra.mxu1 %v958_v53 }
 0x278   :  { %899 = vmatprep.subr.bf16.mxu1 %v967_v0 }
 0x27b   :  { %900 = vmatpush3.bf16.msra.mxu1 %v959_v54 }
 0x27c   :  { %901 = vmatprep.subr.bf16.mxu1 %v967_v0 }
 0x27f   :  { %902 = vmatpush3.bf16.msra.mxu1 %v960_v63 }
 0x280   :  { %919 = vmatprep.subr.bf16.mxu1 %v967_v0 }
 0x322   :  { %v350_v56 = vpop.f32.mrf.mxu1 }
 0x323   :  { %v364_v57 = vadd.f32 %v770_v55, %v350_v56 }
 0x324   :  { %v352_v58 = vpop.f32.mrf.mxu1 }
 0x325   :  { %v365_v59 = vmax.f32 %v364_v57, 0.0 }
 0x326   :  { %v354_v60 = vpop.f32.mrf.mxu1 }
 0x327   :  { %v366_v61 = vpack.c.bf16 %v365_v59, %v365_v59 }
 0x328   :  { %v355_v62 = vpop.f32.mrf.mxu1 }
 0x329   :  { %884 = vmatmul.mubr.bf16.vlgmr.msra.gmra.mxu0 %v366_v61 }
 0x32a   :  { %915 = vmatprep.mubr.msk.bf16.mxu0 %vm968_vm0, %v967_v0  ;;  %908 = vmatpush3.bf16.msra.mxu0 %v961_v1 }
 0x32b   :  { %909 = vmatprep.subr.bf16.mxu0 %v967_v0 }
 0x32e   :  { %910 = vmatpush3.bf16.msra.mxu0 %v962_v2 }
 0x32f   :  { %911 = vmatprep.subr.bf16.mxu0 %v967_v0 }
 0x332   :  { %912 = vmatpush3.bf16.msra.mxu0 %v963_v10 }
 0x333   :  { %913 = vmatprep.subr.bf16.mxu0 %v967_v0 }
 0x336   :  { %914 = vmatpush3.bf16.msra.mxu0 %v964_v11 }
 0x3e9   :  { %v472_v4 = vpop.f32.mrf.mxu0 }
 0x3ea   :  { %v473_v5 = vadd.f32 %v771_v3, %v472_v4 }
 0x3eb   :  { %v885_v6 = vpop.f32.mrf.mxu0 }
 0x3ec   :  { %v478_v7 = vpack.c.bf16 %v473_v5, %v473_v5 }
 0x3ed   :  { %v475_v8 = vpop.f32.mrf.mxu0 }
 0x3ee   :  { %904 = vmatmul.mubr.bf16.vlgmr.msra.gmra.mxu1 %v478_v7 }
 0x3ef   :  { %v886_v9 = vpop.f32.mrf.mxu0  ;;  %923 = vmatprep.mubr.msk.bf16.mxu1 %vm968_vm0, %v967_v0  ;;  %920 = vmatpush3.bf16.msra.mxu1 %v965_v12 }
 0x3f0   :  { %921 = vmatprep.subr.bf16.mxu1 %v967_v0  ;;  %v789_v0 = vld [vmem:[%s1260_s14] ss:$0 sm:$0xff] }
 0x3f3   :  { %922 = vmatpush3.bf16.msra.mxu1 %v966_v22 }
 0x4ae   :  { %v577_v13 = vpop.f32.mrf.mxu1 }
 0x4af   :  { %v583_v15 = vadd.f32 %v577_v13, %v352_v58 }
 0x4b0   :  { %v905_v16 = vpop.f32.mrf.mxu1 }
 0x4b1   :  { %v591_v17 = vadd.f32 %v788_v14, %v583_v15 }
 0x4b2   :  { %v580_v18 = vpop.f32.mrf.mxu1 }
 0x4b3   :  { %v592_v19 = vmax.f32 %v591_v17, 0.0 }
 0x4b4   :  { %v906_v20 = vpop.f32.mrf.mxu1 }
 0x4b5   :  { %v593_v21 = vpack.c.bf16 %v592_v19, %v592_v19 }
 0x4b7   :  { %916 = vmatmul.mubr.msk.bf16.vlgmr.msra.gmra.mxu0 %vm158_vm2, %v593_v21 }
 0x577   :  { %v670_v23 = vpop.f32.mrf.mxu0 }
 0x578   :  { %v671_v24 = vadd.f32 %v789_v0, %v670_v23 }
 0x579   :  { %v917_v25 = vpop.f32.mrf.mxu0 }
 0x57a   :  { %v676_v26 = vmax.f32 %v671_v24, 0.0 }
 0x57b   :  { %v673_v27 = vpop.f32.mrf.mxu0 }
 0x57c   :  { %v677_v28 = vpack.c.bf16 %v676_v26, %v676_v26 }
 0x57d   :  { %v918_v29 = vpop.f32.mrf.mxu0 }
 0x57e   :  { %924 = vmatmul.mubr.msk.bf16.vlgmr.msra.gmra.mxu1 %vm312_vm3, %v677_v28 }
 0x63e   :  { %v738_v31 = vpop.f32.mrf.mxu1 }
 0x63f   :  { %v739_v32 = vadd.f32 %v795_v30, %v738_v31 }
 0x640   :  { %v925_v33 = vpop.f32.mrf.mxu1 }
 0x641   :  { %v744_v34 = vadd.f32 %v739_v32, %v473_v5 }
 0x642   :  { %v741_v35 = vpop.f32.mrf.mxu1 }
 0x643   :  { %745 = vst [vmem:[%s1262_s17] sm:$0xff] %v744_v34 }
 0x644   :  { %v926_v36 = vpop.f32.mrf.mxu1 }

</bundles_post_ra>
